<compile_context>
chip_gen: v7x
topology: tpu7x:2x2x1
jax: 0.10.0
libtpu: 0.0.40
codegen_flags: <defaults>
</compile_context>

<pallas_src>
import functools

import jax
import jax.numpy as jnp
from jax.experimental import pallas as pl
from jax.experimental.pallas import tpu as pltpu


RESNEXT_CFG = ((64, 3, 1), (128, 4, 2), (256, 6, 2), (512, 3, 2))
_BN_EPS = 1e-5
_BN_SCALE = 1.0 / (1.0 + _BN_EPS) ** 0.5   # gamma=1, var=1, mean=0, beta=0


def _round_up(x, m):
    return (x + m - 1) // m * m


def _pick_tile(dim):
    """Largest tile in {512,384,256,128} dividing round_up(dim, 128)."""
    dp = _round_up(dim, 128)
    for c in (512, 384, 256, 128):
        if dp % c == 0:
            return c, dp
    return 128, dp


# ----------------------------------------------------------------------------
# Fused matmul kernel: out = [relu]( a @ b + bias [+ residual] )
# bf16 operands, f32 accumulation, epilogue fused on the last K step.
# ----------------------------------------------------------------------------
def _mm_fused_kernel(relu, has_res, *refs):
    if has_res:
        a_ref, b_ref, bias_ref, res_ref, o_ref, acc_ref = refs
    else:
        a_ref, b_ref, bias_ref, o_ref, acc_ref = refs
        res_ref = None

    @pl.when(pl.program_id(2) == 0)
    def _():
        acc_ref[...] = jnp.zeros_like(acc_ref)

    acc_ref[...] += jnp.dot(a_ref[...], b_ref[...],
                            preferred_element_type=jnp.float32)

    @pl.when(pl.program_id(2) == pl.num_programs(2) - 1)
    def _():
        y = acc_ref[...] + bias_ref[...]
        if has_res:
            y = y + res_ref[...].astype(jnp.float32)
        if relu:
            y = jnp.maximum(y, 0.0)
        o_ref[...] = y.astype(o_ref.dtype)


def pl_matmul_fused(a, b, bias, residual=None, relu=False,
                    out_dtype=jnp.bfloat16):
    """a: (M, K) (cast to bf16), b: (K, N) bf16 weight, bias: (N,) f32,
    residual: (M, N) or None.  Returns (M, N) in out_dtype."""
    M, K = a.shape
    Kb, N = b.shape
    assert K == Kb
    tm = min(512, _round_up(max(M, 1), 16))
    tk, Kp = _pick_tile(K)
    tn, Np = _pick_tile(N)
    Mp = _round_up(M, tm)

    a = a.astype(jnp.bfloat16)
    b = b.astype(jnp.bfloat16)
    if (Mp, Kp) != (M, K):
        a = jnp.pad(a, ((0, Mp - M), (0, Kp - K)))
    if (Kp, Np) != (K, N):
        b = jnp.pad(b, ((0, Kp - K), (0, Np - N)))
    bias_p = bias.astype(jnp.float32)
    if Np != N:
        bias_p = jnp.pad(bias_p, (0, Np - N))
    bias_p = bias_p.reshape(1, Np)

    operands = [a, b, bias_p]
    in_specs = [
        pl.BlockSpec((tm, tk), lambda i, j, k: (i, k)),
        pl.BlockSpec((tk, tn), lambda i, j, k: (k, j)),
        pl.BlockSpec((1, tn), lambda i, j, k: (0, j)),
    ]
    has_res = residual is not None
    if has_res:
        r = residual.astype(jnp.bfloat16)
        if (Mp, Np) != (M, N):
            r = jnp.pad(r, ((0, Mp - M), (0, Np - N)))
        operands.append(r)
        in_specs.append(pl.BlockSpec((tm, tn), lambda i, j, k: (i, j)))

    out_bytes = Mp * Np * jnp.dtype(out_dtype).itemsize
    bytes_accessed = (Mp * Kp * 2 + Kp * Np * 2 + Np * 4 + out_bytes
                      + (Mp * Np * 2 if has_res else 0))
    out = pl.pallas_call(
        functools.partial(_mm_fused_kernel, relu, has_res),
        out_shape=jax.ShapeDtypeStruct((Mp, Np), out_dtype),
        grid=(Mp // tm, Np // tn, Kp // tk),
        in_specs=in_specs,
        out_specs=pl.BlockSpec((tm, tn), lambda i, j, k: (i, j)),
        scratch_shapes=[pltpu.VMEM((tm, tn), jnp.float32)],
        compiler_params=pltpu.CompilerParams(
            dimension_semantics=("parallel", "parallel", "arbitrary"),
            vmem_limit_bytes=32 << 20),
        cost_estimate=pl.CostEstimate(flops=2 * Mp * Np * Kp,
                                      transcendentals=0,
                                      bytes_accessed=bytes_accessed),
    )(*operands)
    if (Mp, Np) != (M, N):
        out = out[:M, :N]
    return out


# ----------------------------------------------------------------------------
# Mean over axis 1 (AdaptiveAvgPool2d(1) and torch.mean(x_lstm, dim=1)):
# one full-channel block per batch row, grid = (B,)  (>= 2 blocks -> megacore)
# ----------------------------------------------------------------------------
def _mean_axis1_kernel(x_ref, o_ref):
    o_ref[...] = jnp.mean(x_ref[...].astype(jnp.float32), axis=1)


def pl_mean_axis1(x):
    """x: (B, L, C) -> (B, C) f32, mean over axis 1."""
    B, L, C = x.shape
    Cp = _round_up(C, 128)
    if Cp != C:
        x = jnp.pad(x, ((0, 0), (0, 0), (0, Cp - C)))
    out = pl.pallas_call(
        _mean_axis1_kernel,
        out_shape=jax.ShapeDtypeStruct((B, Cp), jnp.float32),
        grid=(B,),
        in_specs=[pl.BlockSpec((1, L, Cp), lambda b: (b, 0, 0))],
        out_specs=pl.BlockSpec((1, Cp), lambda b: (b, 0)),
        compiler_params=pltpu.CompilerParams(
            dimension_semantics=("parallel",)),
    )(x)
    return out if Cp == C else out[:, :C]


# ----------------------------------------------------------------------------
# Fused LSTM over the whole sequence in ONE pallas_call.
#   - W_hh is DMA'd once (grid step 0) into a 32 MiB VMEM scratch and kept
#     resident for every time step.
#   - h / c live in VMEM scratch and carry across the "arbitrary" time axis.
#   - gate nonlinearities + cell update fused in the same kernel.
# ----------------------------------------------------------------------------
def _lstm_seq_kernel(gx_ref, w_hbm, out_ref, w_vmem, h_sc, c_sc, sem):
    t = pl.program_id(0)

    @pl.when(t == 0)
    def _():
        cp = pltpu.make_async_copy(w_hbm, w_vmem, sem)
        cp.start()
        h_sc[...] = jnp.zeros_like(h_sc)
        c_sc[...] = jnp.zeros_like(c_sc)
        cp.wait()

    hd = h_sc.shape[1]
    gates = jnp.dot(h_sc[...].astype(jnp.bfloat16), w_vmem[...],
                    preferred_element_type=jnp.float32) + gx_ref[0]
    i_g = jax.nn.sigmoid(gates[:, 0 * hd:1 * hd])
    f_g = jax.nn.sigmoid(gates[:, 1 * hd:2 * hd])
    g_g = jnp.tanh(gates[:, 2 * hd:3 * hd])
    o_g = jax.nn.sigmoid(gates[:, 3 * hd:4 * hd])
    c_new = f_g * c_sc[...] + i_g * g_g
    h_new = o_g * jnp.tanh(c_new)
    c_sc[...] = c_new
    h_sc[...] = h_new
    out_ref[0] = h_new


def lstm_forward(feats, lp):
    """nn.LSTM(batch_first=False) applied to the (B, T, F) tensor: dim 0 is
    treated as time and dim 1 as the LSTM batch (matching the PyTorch code)."""
    seq, batch, _ = feats.shape
    Hd = lp['w_hh'].shape[0]
    # All input-gate matmuls in one pass, bias (b_ih + b_hh) fused.
    gx = pl_matmul_fused(feats.reshape(seq * batch, -1), lp['w_ih'], lp['b'],
                         relu=False, out_dtype=jnp.float32)
    gx = gx.reshape(seq, batch, 4 * Hd)
    Bp = _round_up(batch, 8)
    if Bp != batch:
        gx = jnp.pad(gx, ((0, 0), (0, Bp - batch), (0, 0)))
    # TODO(synk): on v7x the 32 MiB resident W_hh could be split across the
    # two TensorCores; a single resident copy under a 48 MiB scoped-VMEM limit
    # fits every current generation, so that split is left undone.
    out = pl.pallas_call(
        _lstm_seq_kernel,
        out_shape=jax.ShapeDtypeStruct((seq, Bp, Hd), jnp.float32),
        grid=(seq,),
        in_specs=[
            pl.BlockSpec((1, Bp, 4 * Hd), lambda t: (t, 0, 0)),
            pl.BlockSpec(memory_space=pl.ANY),          # W_hh stays in HBM
        ],
        out_specs=pl.BlockSpec((1, Bp, Hd), lambda t: (t, 0, 0)),
        scratch_shapes=[
            pltpu.VMEM((Hd, 4 * Hd), jnp.bfloat16),     # resident W_hh
            pltpu.VMEM((Bp, Hd), jnp.float32),          # h
            pltpu.VMEM((Bp, Hd), jnp.float32),          # c
            pltpu.SemaphoreType.DMA,
        ],
        compiler_params=pltpu.CompilerParams(
            dimension_semantics=("arbitrary",),
            vmem_limit_bytes=48 << 20),
        cost_estimate=pl.CostEstimate(
            flops=2 * seq * Bp * Hd * 4 * Hd,
            transcendentals=5 * seq * Bp * Hd,
            bytes_accessed=(Hd * 4 * Hd * 2 + seq * Bp * 4 * Hd * 4
                            + seq * Bp * Hd * 4)),
    )(gx, lp['w_hh'])
    return out[:, :batch, :]   # (seq=B, batch=T, Hd)


# ----------------------------------------------------------------------------
# Grouped 3x3 conv: ONE pallas_call per conv.  Grid = (M tiles, slabs); the 9
# taps are unrolled in-kernel over a taps-major patch block (no per-slab
# Python loop, no per-slab launches).  Block-diagonal per-tap slab weights are
# built once at parameter time.
# ----------------------------------------------------------------------------
def _gconv_kernel(a_ref, w_ref, bias_ref, o_ref):
    acc = jnp.zeros(o_ref.shape, jnp.float32)
    for t in range(9):
        acc += jnp.dot(a_ref[t], w_ref[0, t],
                       preferred_element_type=jnp.float32)
    o_ref[...] = jnp.maximum(acc + bias_ref[...], 0.0).astype(o_ref.dtype)


def _im2col_taps(x, kh, kw, stride, pad):
    """x NHWC -> (kh*kw, N*OH*OW, C) taps-major patches (tap = i*kw + j)."""
    N, H, W, C = x.shape
    if pad:
        x = jnp.pad(x, ((0, 0), (pad, pad), (pad, pad), (0, 0)))
    OH = (H + 2 * pad - kh) // stride + 1
    OW = (W + 2 * pad - kw) // stride + 1
    cols = [x[:, i:i + OH * stride:stride, j:j + OW * stride:stride, :]
            for i in range(kh) for j in range(kw)]
    return jnp.stack(cols, axis=0).reshape(kh * kw, N * OH * OW, C), OH, OW


def grouped_conv3x3(x, w_slabs, bias, stride):
    """ResNeXt grouped 3x3 conv + bias + ReLU, one pallas_call."""
    # TODO(synk): im2col patch extraction is still plain-JAX glue; a fully
    # in-kernel tap shift (pl.Element offsets) would remove the 9x HBM patch
    # materialization at larger spatial sizes.
    N, _, _, width = x.shape
    n_slab = w_slabs.shape[0]
    patches, OH, OW = _im2col_taps(x.astype(jnp.bfloat16), 3, 3, stride, 1)
    M = N * OH * OW
    tm = min(512, _round_up(M, 8))
    Mp = _round_up(M, tm)
    if Mp != M:
        patches = jnp.pad(patches, ((0, 0), (0, Mp - M), (0, 0)))
    bias2 = bias.reshape(n_slab, 128).astype(jnp.float32)

    flops = 2 * Mp * width * 9 * 128
    bytes_accessed = patches.size * 2 + w_slabs.size * 2 + Mp * width * 2
    out = pl.pallas_call(
        _gconv_kernel,
        out_shape=jax.ShapeDtypeStruct((Mp, width), jnp.bfloat16),
        grid=(Mp // tm, n_slab),
        in_specs=[
            pl.BlockSpec((9, tm, 128), lambda i, s: (0, i, s)),
            pl.BlockSpec((1, 9, 128, 128), lambda i, s: (s, 0, 0, 0)),
            pl.BlockSpec((1, 128), lambda i, s: (s, 0)),
        ],
        out_specs=pl.BlockSpec((tm, 128), lambda i, s: (i, s)),
        compiler_params=pltpu.CompilerParams(
            dimension_semantics=("parallel", "parallel"),
            vmem_limit_bytes=32 << 20),
        cost_estimate=pl.CostEstimate(flops=flops, transcendentals=0,
                                      bytes_accessed=bytes_accessed),
    )(patches, w_slabs, bias2)
    if Mp != M:
        out = out[:M]
    return out.reshape(N, OH, OW, width)


# ----------------------------------------------------------------------------
# Convolution wrappers (im2col / slicing glue in JAX, matmuls in Pallas)
# ----------------------------------------------------------------------------
def _im2col(x, kh, kw, stride, pad):
    """x NHWC -> (N, OH, OW, kh*kw, C) patches (tap index = i*kw + j)."""
    N, H, W, C = x.shape
    if pad:
        x = jnp.pad(x, ((0, 0), (pad, pad), (pad, pad), (0, 0)))
    OH = (H + 2 * pad - kh) // stride + 1
    OW = (W + 2 * pad - kw) // stride + 1
    cols = []
    for i in range(kh):
        for j in range(kw):
            cols.append(x[:, i:i + OH * stride:stride,
                          j:j + OW * stride:stride, :])
    return jnp.stack(cols, axis=3), OH, OW


def conv1x1(x, w_kn, bias, stride=1, relu=False, residual=None):
    """x: NHWC, w_kn: (Cin, Cout) bf16, bias: (Cout,) f32; epilogue fused."""
    if stride > 1:
        x = x[:, ::stride, ::stride, :]
    N, OH, OW, Cin = x.shape
    Cout = w_kn.shape[1]
    a = x.reshape(N * OH * OW, Cin)
    r = residual.reshape(N * OH * OW, Cout) if residual is not None else None
    out = pl_matmul_fused(a, w_kn, bias, residual=r, relu=relu)
    return out.reshape(N, OH, OW, Cout)


def maxpool2d(x, k=3, stride=2, pad=1):
    # TODO(synk): 3x3 max-pool kept in plain JAX glue (single cheap occurrence).
    N, H, W, C = x.shape
    xp = jnp.pad(x, ((0, 0), (pad, pad), (pad, pad), (0, 0)),
                 constant_values=-jnp.inf)
    OH = (H + 2 * pad - k) // stride + 1
    OW = (W + 2 * pad - k) // stride + 1
    cols = [xp[:, i:i + OH * stride:stride, j:j + OW * stride:stride, :]
            for i in range(k) for j in range(k)]
    return jnp.max(jnp.stack(cols, axis=0), axis=0)


# ----------------------------------------------------------------------------
# Jitted forward stages
# ----------------------------------------------------------------------------
@jax.jit
def stem_forward(x_nhwc, w147, b1):
    N = x_nhwc.shape[0]
    p, OH, OW = _im2col(x_nhwc, 7, 7, 2, 3)
    a = p.reshape(N * OH * OW, -1)
    out = pl_matmul_fused(a, w147, b1, relu=True)
    x = out.reshape(N, OH, OW, w147.shape[1])
    return maxpool2d(x, 3, 2, 1)


@functools.partial(jax.jit, static_argnames=("stride",))
def bottleneck_forward(x, p, stride):
    out = conv1x1(x, p['w1'], p['b1'], relu=True)
    out = grouped_conv3x3(out, p['w2s'], p['b2'], stride)
    if 'wd' in p:
        # downsample bias fused into its own matmul epilogue (no extra pass)
        identity = conv1x1(x, p['wd'], p['bd'], stride=stride, relu=False)
    else:
        identity = x
    # conv3 with bias + residual + ReLU fused in the matmul epilogue
    return conv1x1(out, p['w3'], p['b3'], relu=True, residual=identity)


@functools.partial(jax.jit, static_argnames=("B",))
def head_forward(fmap_nhwc, lstm_p, linear_w, linear_b, B):
    BT, fh, fw, fc = fmap_nhwc.shape
    T = BT // B
    pooled = pl_mean_axis1(fmap_nhwc.reshape(BT, fh * fw, fc))  # AdaptiveAvgPool2d(1)
    feats = pooled.reshape(B, T, fc)
    x_lstm = lstm_forward(feats, lstm_p)           # (B, T, Hd)
    mean_lstm = pl_mean_axis1(x_lstm)              # torch.mean(x_lstm, dim=1)
    logits = pl_matmul_fused(mean_lstm, linear_w, linear_b, relu=False,
                             out_dtype=jnp.float32)
    # TODO(synk): Dropout(p=0.4) is identity in eval mode; the module's unused
    # nn.LeakyReLU is likewise a no-op in its forward.
    return logits


# ----------------------------------------------------------------------------
# Deterministic parameter generation (BN folded, weights pre-transposed/bf16)
# ----------------------------------------------------------------------------
class ParamGen:
    def __init__(self, seed=0):
        self.key = jax.random.PRNGKey(seed)
        self.count = 0

    def _next(self):
        self.count += 1
        return jax.random.fold_in(self.key, self.count)

    def conv(self, cout, cin_g, k):
        fan_in = cin_g * k * k
        scale = (2.0 / fan_in) ** 0.5
        return jax.random.normal(self._next(), (cout, cin_g, k, k),
                                 jnp.float32) * scale

    def dense(self, out_f, in_f, scale):
        return jax.random.normal(self._next(), (out_f, in_f),
                                 jnp.float32) * scale

    def vec(self, n, scale):
        if scale == 0.0:
            return jnp.zeros((n,), jnp.float32)
        return jax.random.normal(self._next(), (n,), jnp.float32) * scale


def _expand_grouped_weight(w2, groups):
    """(width, cin_g, 3, 3) grouped weight -> (n_slab, 9, 128, 128) per-tap
    block-diagonal slab weights (cin_g == cout_g for ResNeXt, so each 128-ch
    slab is independent of the others)."""
    width, cin_g, kh, kw = w2.shape
    cout_g = width // groups
    assert cin_g == cout_g and width % 128 == 0
    n_slab = width // 128
    gpb = 128 // cout_g                               # groups per 128-ch slab
    w = w2.reshape(n_slab, gpb, cout_g, cin_g, kh, kw)
    wt = jnp.transpose(w, (0, 4, 5, 1, 3, 2))         # (s, ki, kj, g, ci, co)
    eye = jnp.eye(gpb, dtype=w2.dtype)
    bd = jnp.einsum('skjgcd,gh->skjgchd', wt, eye)    # block-diag over groups
    # TODO(synk): densifying each per-tap 128x128 block inflates grouped-conv
    # FLOPs/weight-bytes by gpb; acceptable at these sizes (memory-bound), pack
    # per-group weights if the grouped conv ever becomes MXU-bound.
    return bd.reshape(n_slab, kh * kw, 128, 128)


def make_bottleneck_params(pg, inplanes, planes, stride, groups=32,
                           base_width=4):
    width = int(planes * base_width / 64) * groups
    out_planes = planes * 4
    w1 = pg.conv(width, inplanes, 1) * _BN_SCALE
    w2 = pg.conv(width, width // groups, 3) * _BN_SCALE
    w3 = pg.conv(out_planes, width, 1) * _BN_SCALE
    p = {
        'w1': w1.reshape(width, inplanes).T.astype(jnp.bfloat16),
        'b1': jnp.zeros((width,), jnp.float32),
        'w2s': _expand_grouped_weight(w2, groups).astype(jnp.bfloat16),
        'b2': jnp.zeros((width,), jnp.float32),
        'w3': w3.reshape(out_planes, width).T.astype(jnp.bfloat16),
        'b3': jnp.zeros((out_planes,), jnp.float32),
    }
    if stride != 1 or inplanes != out_planes:
        wd = pg.conv(out_planes, inplanes, 1) * _BN_SCALE
        p['wd'] = wd.reshape(out_planes, inplanes).T.astype(jnp.bfloat16)
        p['bd'] = jnp.zeros((out_planes,), jnp.float32)
    return p


def make_model_params(num_classes=2, latent_dim=2048, hidden_dim=2048, seed=0):
    pg = ParamGen(seed)
    w7 = pg.conv(64, 3, 7) * _BN_SCALE
    backbone = {
        'conv1': jnp.transpose(w7, (2, 3, 1, 0)).reshape(7 * 7 * 3, 64)
                    .astype(jnp.bfloat16),
        'b1': jnp.zeros((64,), jnp.float32),
        'layers': [],
    }
    inplanes = 64
    for planes, blocks, stride in RESNEXT_CFG:
        blist = []
        for bi in range(blocks):
            s = stride if bi == 0 else 1
            blist.append(make_bottleneck_params(pg, inplanes, planes, s))
            inplanes = planes * 4
        backbone['layers'].append(blist)

    Hd = hidden_dim
    lstm_scale = (1.0 / Hd) ** 0.5
    w_ih = pg.dense(4 * Hd, latent_dim, lstm_scale)
    w_hh = pg.dense(4 * Hd, Hd, lstm_scale)
    b_ih = pg.vec(4 * Hd, lstm_scale)
    b_hh = pg.vec(4 * Hd, lstm_scale)
    lstm = {
        'w_ih': w_ih.T.astype(jnp.bfloat16),   # (latent, 4H), [i|f|g|o] cols
        'w_hh': w_hh.T.astype(jnp.bfloat16),   # (H, 4H)
        'b': b_ih + b_hh,                      # (4H,) f32
    }
    lin_scale = (1.0 / 2048) ** 0.5
    return {
        'backbone': backbone,
        'lstm': lstm,
        'linear_w': pg.dense(num_classes, 2048, lin_scale).T
                      .astype(jnp.bfloat16),
        'linear_b': pg.vec(num_classes, lin_scale),
    }


# ----------------------------------------------------------------------------
# Model forward
# ----------------------------------------------------------------------------
def model_forward(x, params):
    B, T, C, H, W = x.shape
    xf = x.reshape(B * T, C, H, W)
    x_nhwc = jnp.transpose(xf, (0, 2, 3, 1)).astype(jnp.bfloat16)

    feat = stem_forward(x_nhwc, params['backbone']['conv1'],
                        params['backbone']['b1'])
    for (planes, blocks, stride), blist in zip(RESNEXT_CFG,
                                               params['backbone']['layers']):
        for bi, bp in enumerate(blist):
            feat = bottleneck_forward(feat, bp,
                                      stride=(stride if bi == 0 else 1))

    logits = head_forward(feat, params['lstm'], params['linear_w'],
                          params['linear_b'], B=B)
    fmap = jnp.transpose(feat, (0, 3, 1, 2)).astype(jnp.float32)   # NCHW
    return fmap, logits


# ----------------------------------------------------------------------------
# Main
# ----------------------------------------------------------------------------
if __name__ == "__main__":
    num_classes = 2
    B, T, C, H, W = 2, 4, 3, 64, 64   # small but ResNet-stride compatible

    params = make_model_params(num_classes=num_classes, seed=0)

    key = jax.random.PRNGKey(0)
    x = jax.random.normal(key, (B, T, C, H, W), dtype=jnp.float32)

    fmap, logits = model_forward(x, params)
    fmap = jax.block_until_ready(fmap)
    logits = jax.block_until_ready(logits)

    assert fmap.shape == (B * T, 2048, H // 32, W // 32), fmap.shape
    assert logits.shape == (B, num_classes), logits.shape
    assert fmap.dtype == jnp.float32 and logits.dtype == jnp.float32
    print("KERNEL_OK")
</pallas_src>

<mosaic_0001>
module attributes {stable_mosaic.version = 11 : i64} {
  func.func @_mm_fused_kernel(%arg0: i32, %arg1: i32, %arg2: i32, %arg3: memref<512x256xbf16, #tpu.memory_space<vmem>>, %arg4: memref<256x128xbf16, #tpu.memory_space<vmem>>, %arg5: memref<1x128xf32, #tpu.memory_space<vmem>>, %arg6: memref<512x128xbf16, #tpu.memory_space<vmem>>, %arg7: memref<512x128xf32, #tpu.memory_space<vmem>>) attributes {dimension_semantics = [#tpu.dimension_semantics<parallel>, #tpu.dimension_semantics<parallel>, #tpu.dimension_semantics<arbitrary>], iteration_bounds = array<i64: 16, 1, 1>, scalar_prefetch = 0 : i64, scratch_operands = 1 : i64, tpu.core_type = #tpu.core_type<tc>, window_params = [{transform_indices = @transform_0, window_bounds = array<i64: 512, 256>}, {transform_indices = @transform_1, window_bounds = array<i64: 256, 128>}, {transform_indices = @transform_2, window_bounds = array<i64: 1, 128>}, {transform_indices = @transform_3, window_bounds = array<i64: 512, 128>}]} {
    %c0_i32 = arith.constant 0 : i32
    %0 = arith.cmpi eq, %arg2, %c0_i32 : i32
    %1 = arith.extui %0 : i1 to i32
    %c0_i32_0 = arith.constant 0 : i32
    %2 = arith.cmpi ne, %1, %c0_i32_0 : i32
    scf.if %2 {
      %cst_10 = arith.constant 0.000000e+00 : f32
      %12 = vector.broadcast %cst_10 : f32 to vector<512x128xf32>
      %c0_11 = arith.constant 0 : index
      %c0_12 = arith.constant 0 : index
      %13 = vector.load %arg7[%c0_11, %c0_12] : memref<512x128xf32, #tpu.memory_space<vmem>>, vector<512x128xf32>
      tpu.vector_store %arg7[%c0_11, %c0_12], %12 {strides = array<i32>} : memref<512x128xf32, #tpu.memory_space<vmem>>, vector<512x128xf32>,
    } else {
    }
    %c0 = arith.constant 0 : index
    %c0_1 = arith.constant 0 : index
    %3 = vector.load %arg7[%c0, %c0_1] : memref<512x128xf32, #tpu.memory_space<vmem>>, vector<512x128xf32>
    %c0_2 = arith.constant 0 : index
    %c0_3 = arith.constant 0 : index
    %4 = vector.load %arg3[%c0_2, %c0_3] : memref<512x256xbf16, #tpu.memory_space<vmem>>, vector<512x256xbf16>
    %c0_4 = arith.constant 0 : index
    %c0_5 = arith.constant 0 : index
    %5 = vector.load %arg4[%c0_4, %c0_5] : memref<256x128xbf16, #tpu.memory_space<vmem>>, vector<256x128xbf16>
    %cst = arith.constant dense<0.000000e+00> : vector<512x128xf32>
    %6 = tpu.matmul %4, %5, %cst {dimension_numbers = #tpu.dot_dimension_numbers<[1], [0], [0], [1], [0, 0, 1, 1], [], []>} : vector<512x256xbf16>, vector<256x128xbf16>, vector<512x128xf32> -> vector<512x128xf32>
    %7 = arith.addf %3, %6 : vector<512x128xf32>
    %c0_6 = arith.constant 0 : index
    %c0_7 = arith.constant 0 : index
    %8 = vector.load %arg7[%c0_6, %c0_7] : memref<512x128xf32, #tpu.memory_space<vmem>>, vector<512x128xf32>
    tpu.vector_store %arg7[%c0_6, %c0_7], %7 {strides = array<i32>} : memref<512x128xf32, #tpu.memory_space<vmem>>, vector<512x128xf32>,
    %c0_i32_8 = arith.constant 0 : i32
    %9 = arith.cmpi eq, %arg2, %c0_i32_8 : i32
    %10 = arith.extui %9 : i1 to i32
    %c0_i32_9 = arith.constant 0 : i32
    %11 = arith.cmpi ne, %10, %c0_i32_9 : i32
    scf.if %11 {
      %c0_10 = arith.constant 0 : index
      %c0_11 = arith.constant 0 : index
      %12 = vector.load %arg7[%c0_10, %c0_11] : memref<512x128xf32, #tpu.memory_space<vmem>>, vector<512x128xf32>
      %c0_12 = arith.constant 0 : index
      %c0_13 = arith.constant 0 : index
      %13 = vector.load %arg5[%c0_12, %c0_13] : memref<1x128xf32, #tpu.memory_space<vmem>>, vector<1x128xf32>
      %14 = vector.broadcast %13 : vector<1x128xf32> to vector<512x128xf32>
      %15 = arith.addf %12, %14 : vector<512x128xf32>
      %cst_14 = arith.constant 0.000000e+00 : f32
      %16 = vector.broadcast %cst_14 : f32 to vector<512x128xf32>
      %17 = arith.maximumf %15, %16 : vector<512x128xf32>
      %18 = arith.truncf %17 : vector<512x128xf32> to vector<512x128xbf16>
      %c0_15 = arith.constant 0 : index
      %c0_16 = arith.constant 0 : index
      %19 = vector.load %arg6[%c0_15, %c0_16] : memref<512x128xbf16, #tpu.memory_space<vmem>>, vector<512x128xbf16>
      tpu.vector_store %arg6[%c0_15, %c0_16], %18 {strides = array<i32>} : memref<512x128xbf16, #tpu.memory_space<vmem>>, vector<512x128xbf16>,
    } else {
    }
    return
  }
  func.func @transform_0(%arg0: i32, %arg1: i32, %arg2: i32) -> (i32, i32) {
    %c0_i32 = arith.constant 0 : i32
    return %arg0, %arg2 : i32, i32
  }
  func.func @transform_1(%arg0: i32, %arg1: i32, %arg2: i32) -> (i32, i32) {
    %c0_i32 = arith.constant 0 : i32
    return %arg2, %arg1 : i32, i32
  }
  func.func @transform_2(%arg0: i32, %arg1: i32, %arg2: i32) -> (i32, i32) {
    %c0_i32 = arith.constant 0 : i32
    %c0_i32_0 = arith.constant 0 : i32
    return %c0_i32, %arg1 : i32, i32
  }
  func.func @transform_3(%arg0: i32, %arg1: i32, %arg2: i32) -> (i32, i32) {
    %c0_i32 = arith.constant 0 : i32
    return %arg0, %arg1 : i32, i32
  }
}

</mosaic_0001>

<bundles_post_ra>
// kernel: stem_forward.1
= control target key start
LH: loop header
LB: loop body
LE: loop exit
PB: predicated region body
PF: predicated region fallthrough
CT: control target
= control target key end

     0   :  { %s2594_s12 = smov 0   ;;  %s2596_s13 = smov 0   ;;  %s2880_s0 = inlined_call_operand.vmem [shape: bf16[8192,256], index: 0, kind: input, shape index: {}]   ;;  %s2881_s1 = inlined_call_operand.vmem [shape: bf16[256,128], index: 1, kind: input, shape index: {}]   ;;  %s2882_s2 = inlined_call_operand.vmem [shape: f32[1,128], index: 2, kind: input, shape index: {}]   ;;  %s2883_s3 = inlined_call_operand.vmem [shape: bf16[8192,128], index: 3, kind: output, shape index: {}]  }
   0x1   :  { %s2598_s14 = smov 0  }
   0x2 LB: > { %s32_s15 = sadd.s32 1, %s2567_s13  ;;  %p1971_p0 = scmp.ge.s32.totalorder %s2571_s14, 1  ;;  %s2571_s14 = sphi %s2598_s14, %s13_s14   ;;  %s2567_s13 = sphi %s2596_s13, %s2885_s13   ;;  %s2563_s12 = sphi %s2594_s12, %s2884_s12  }
   0x3   : > { %p34_p1 = scmp.ge.s32.totalorder %s32_s15, 16  ;;  %p191_p2 = scmp.lt.s32.totalorder %s2571_s14, 17 }
   0x5   : > { %s2887_s15 = smov (%p34_p1, %s32_s15), 0  ;;  %p192_p3 = pnand %p1971_p0, %p191_p2 }
   0x6   : > { %v2437_v0 = vld [vmem:[%s2881_s1] sm:$0xff] (!%p192_p3)   ;;  %v2573_v1 = vmov (!%p192_p3), 0   ;;  %s1972_s18 = sshll.u32 (!%p192_p3), %s2563_s12, 6  ;;  %v2438_v2 = vld [vmem:[%s2881_s1 + $0x8] sm:$0xff] (!%p192_p3)   ;;  %v2439_v3 = vld [vmem:[%s2881_s1 + $0x10] sm:$0xff] (!%p192_p3)  }
   0x7   : > { %195 = sbr.rel (%p192_p3) target bundleno = 412 (0x19c), region = 32  ;;  %912 = vmatprep.subr.bf16.mxu0 (!%p192_p3), %v2573_v1  ;;  %2380 = vmatprep.subr.bf16.mxu1 (!%p192_p3), %v2573_v1  ;;  %p236_p4 = scmp.lt.s32.totalorder (!%p192_p3), %s1972_s18, 1023  ;;  %v2440_v4 = vld [vmem:[%s2881_s1 + $0x18] sm:$0xff] (!%p192_p3)   ;;  %v2441_v5 = vld [vmem:[%s2881_s1 + $0x20] sm:$0xff] (!%p192_p3)   ;;  %v2442_v7 = vld [vmem:[%s2881_s1 + $0x28] sm:$0xff] (!%p192_p3)  }
   0x8   : > { %913 = vmatpush1.bf16.msra.mxu0 (!%p192_p3), %v2437_v0  ;;  %2396 = vmatpush1.bf16.msra.mxu1 (!%p192_p3), %v2437_v0  ;;  %v2443_v9 = vld [vmem:[%s2881_s1 + $0x30] sm:$0xff] (!%p192_p3)   ;;  %v2444_v10 = vld [vmem:[%s2881_s1 + $0x38] sm:$0xff] (!%p192_p3)   ;;  %v2445_v11 = vld [vmem:[%s2881_s1 + $0x40] sm:$0xff] (!%p192_p3)  }
   0x9   : > { %914 = vmatprep.subr.bf16.mxu0 (!%p192_p3), %v2573_v1  ;;  %2381 = vmatprep.subr.bf16.mxu1 (!%p192_p3), %v2573_v1  ;;  %v2446_v12 = vld [vmem:[%s2881_s1 + $0x48] sm:$0xff] (!%p192_p3)   ;;  %v2447_v13 = vld [vmem:[%s2881_s1 + $0x50] sm:$0xff] (!%p192_p3)   ;;  %v2448_v14 = vld [vmem:[%s2881_s1 + $0x58] sm:$0xff] (!%p192_p3)  }
   0xa   : > { %v2449_v15 = vld [vmem:[%s2881_s1 + $0x60] sm:$0xff] (!%p192_p3)   ;;  %v2450_v16 = vld [vmem:[%s2881_s1 + $0x68] sm:$0xff] (!%p192_p3)   ;;  %v2451_v17 = vld [vmem:[%s2881_s1 + $0x70] sm:$0xff] (!%p192_p3)  }
   0xb   : > { %v2452_v18 = vld [vmem:[%s2881_s1 + $0x78] sm:$0xff] (!%p192_p3)  }
   0xc   : > { %915 = vmatpush1.bf16.msra.mxu0 (!%p192_p3), %v2438_v2  ;;  %2397 = vmatpush1.bf16.msra.mxu1 (!%p192_p3), %v2438_v2 }
   0xd   : > { %916 = vmatprep.subr.bf16.mxu0 (!%p192_p3), %v2573_v1  ;;  %2382 = vmatprep.subr.bf16.mxu1 (!%p192_p3), %v2573_v1 }
   0xe   : > { %s2889_s18 = smov (!%p236_p4, %s1972_s18), 1023 }
   0xf   : > { %s2124_s25 = sshll.u32 %s2889_s18, 3  ;;  %s1976_s6 = sshll.u32 %s2889_s18, 2 }
  0x10   : > { %917 = vmatpush1.bf16.msra.mxu0 %v2439_v3  ;;  %2398 = vmatpush1.bf16.msra.mxu1 %v2439_v3  ;;  %s2641_s30 = scalar_lea.vmem %s2880_s0, %s2124_s25  ;;  %s2777_s8 = scalar_lea.vmem %s2883_s3, %s1976_s6 }
  0x11   : > { %918 = vmatprep.subr.bf16.mxu0 %v2573_v1  ;;  %2383 = vmatprep.subr.bf16.mxu1 %v2573_v1  ;;  %v2455_v6 = vld [vmem:[%s2641_s30 + $0x4] ss:$8 sps:$4 sm:$0xff]   ;;  %v2453_v19 = vld [vmem:[%s2641_s30] ss:$8 sps:$4 sm:$0xff]   ;;  %v2459_v21 = vld [vmem:[%s2641_s30 + $0x14] ss:$8 sps:$4 sm:$0xff]  }
  0x12   : > { %v2458_v8 = vld [vmem:[%s2641_s30 + $0x104] ss:$8 sps:$4 sm:$0xff]   ;;  %944 = vmatprep.mubr.bf16.mxu0 %v2455_v6  ;;  %v2456_v20 = vld [vmem:[%s2641_s30 + $0x100] ss:$8 sps:$4 sm:$0xff]   ;;  %v2461_v22 = vld [vmem:[%s2641_s30 + $0x114] ss:$8 sps:$4 sm:$0xff]  }
  0x13   : > { %1072 = vmatprep.mubr.bf16.mxu1 %v2458_v8  ;;  %v2463_v23 = vld [vmem:[%s2641_s30 + $0x10] ss:$8 sps:$4 sm:$0xff]   ;;  %v2465_v25 = vld [vmem:[%s2641_s30 + $0x24] ss:$8 sps:$4 sm:$0xff]   ;;  %v2469_v27 = vld [vmem:[%s2641_s30 + $0x20] ss:$8 sps:$4 sm:$0xff]  }
  0x14   : > { %919 = vmatpush1.bf16.msra.mxu0 %v2440_v4  ;;  %2399 = vmatpush1.bf16.msra.mxu1 %v2440_v4  ;;  %v2464_v24 = vld [vmem:[%s2641_s30 + $0x110] ss:$8 sps:$4 sm:$0xff]   ;;  %v2467_v26 = vld [vmem:[%s2641_s30 + $0x124] ss:$8 sps:$4 sm:$0xff]   ;;  %v2470_v28 = vld [vmem:[%s2641_s30 + $0x120] ss:$8 sps:$4 sm:$0xff]  }
  0x15   : > { %920 = vmatprep.subr.bf16.mxu0 %v2573_v1  ;;  %2384 = vmatprep.subr.bf16.mxu1 %v2573_v1  ;;  %v2471_v29 = vld [vmem:[%s2641_s30 + $0x34] ss:$8 sps:$4 sm:$0xff]   ;;  %v2475_v31 = vld [vmem:[%s2641_s30 + $0x30] ss:$8 sps:$4 sm:$0xff]   ;;  %v2477_v33 = vld [vmem:[%s2641_s30 + $0x44] ss:$8 sps:$4 sm:$0xff]  }
  0x16   : > { %v2473_v30 = vld [vmem:[%s2641_s30 + $0x134] ss:$8 sps:$4 sm:$0xff]   ;;  %v2476_v32 = vld [vmem:[%s2641_s30 + $0x130] ss:$8 sps:$4 sm:$0xff]   ;;  %v2479_v34 = vld [vmem:[%s2641_s30 + $0x144] ss:$8 sps:$4 sm:$0xff]  }
  0x17   : > { %v2481_v35 = vld [vmem:[%s2641_s30 + $0x40] ss:$8 sps:$4 sm:$0xff]   ;;  %v2483_v37 = vld [vmem:[%s2641_s30 + $0x54] ss:$8 sps:$4 sm:$0xff]   ;;  %v2487_v39 = vld [vmem:[%s2641_s30 + $0x50] ss:$8 sps:$4 sm:$0xff]  }
  0x18   : > { %921 = vmatpush1.bf16.msra.mxu0 %v2441_v5  ;;  %2400 = vmatpush1.bf16.msra.mxu1 %v2441_v5  ;;  %v2482_v36 = vld [vmem:[%s2641_s30 + $0x140] ss:$8 sps:$4 sm:$0xff]   ;;  %v2485_v38 = vld [vmem:[%s2641_s30 + $0x154] ss:$8 sps:$4 sm:$0xff]   ;;  %v2488_v40 = vld [vmem:[%s2641_s30 + $0x150] ss:$8 sps:$4 sm:$0xff]  }
  0x19   : > { %922 = vmatprep.subr.bf16.mxu0 %v2573_v1  ;;  %2385 = vmatprep.subr.bf16.mxu1 %v2573_v1  ;;  %v2489_v41 = vld [vmem:[%s2641_s30 + $0x64] ss:$8 sps:$4 sm:$0xff]   ;;  %v2493_v43 = vld [vmem:[%s2641_s30 + $0x60] ss:$8 sps:$4 sm:$0xff]   ;;  %v2495_v45 = vld [vmem:[%s2641_s30 + $0x74] ss:$8 sps:$4 sm:$0xff]  }
  0x1a   : > { %v2491_v42 = vld [vmem:[%s2641_s30 + $0x164] ss:$8 sps:$4 sm:$0xff]   ;;  %v2494_v44 = vld [vmem:[%s2641_s30 + $0x160] ss:$8 sps:$4 sm:$0xff]   ;;  %v2497_v46 = vld [vmem:[%s2641_s30 + $0x174] ss:$8 sps:$4 sm:$0xff]  }
  0x1b   : > { %v2499_v47 = vld [vmem:[%s2641_s30 + $0x70] ss:$8 sps:$4 sm:$0xff]   ;;  %v2501_v49 = vld [vmem:[%s2641_s30 + $0x84] ss:$8 sps:$4 sm:$0xff]   ;;  %v2505_v51 = vld [vmem:[%s2641_s30 + $0x80] ss:$8 sps:$4 sm:$0xff]  }
  0x1c   : > { %923 = vmatpush1.bf16.msra.mxu0 %v2442_v7  ;;  %2401 = vmatpush1.bf16.msra.mxu1 %v2442_v7  ;;  %v2500_v48 = vld [vmem:[%s2641_s30 + $0x170] ss:$8 sps:$4 sm:$0xff]   ;;  %v2503_v50 = vld [vmem:[%s2641_s30 + $0x184] ss:$8 sps:$4 sm:$0xff]   ;;  %v2506_v52 = vld [vmem:[%s2641_s30 + $0x180] ss:$8 sps:$4 sm:$0xff]  }
  0x1d   : > { %924 = vmatprep.subr.bf16.mxu0 %v2573_v1  ;;  %2386 = vmatprep.subr.bf16.mxu1 %v2573_v1  ;;  %v2507_v53 = vld [vmem:[%s2641_s30 + $0x94] ss:$8 sps:$4 sm:$0xff]   ;;  %v2511_v55 = vld [vmem:[%s2641_s30 + $0x90] ss:$8 sps:$4 sm:$0xff]   ;;  %v2513_v57 = vld [vmem:[%s2641_s30 + $0xa4] ss:$8 sps:$4 sm:$0xff]  }
  0x1e   : > { %v2509_v54 = vld [vmem:[%s2641_s30 + $0x194] ss:$8 sps:$4 sm:$0xff]   ;;  %v2512_v56 = vld [vmem:[%s2641_s30 + $0x190] ss:$8 sps:$4 sm:$0xff]   ;;  %v2515_v58 = vld [vmem:[%s2641_s30 + $0x1a4] ss:$8 sps:$4 sm:$0xff]  }
  0x1f   : > { %v2517_v59 = vld [vmem:[%s2641_s30 + $0xa0] ss:$8 sps:$4 sm:$0xff]   ;;  %v2519_v61 = vld [vmem:[%s2641_s30 + $0xb4] ss:$8 sps:$4 sm:$0xff]   ;;  %v2523_v63 = vld [vmem:[%s2641_s30 + $0xb0] ss:$8 sps:$4 sm:$0xff]  }
  0x20   : > { %925 = vmatpush1.bf16.msra.mxu0 %v2443_v9  ;;  %2402 = vmatpush1.bf16.msra.mxu1 %v2443_v9  ;;  %v2518_v60 = vld [vmem:[%s2641_s30 + $0x1a0] ss:$8 sps:$4 sm:$0xff]   ;;  %v2521_v62 = vld [vmem:[%s2641_s30 + $0x1b4] ss:$8 sps:$4 sm:$0xff]   ;;  %v2524_v0 = vld [vmem:[%s2641_s30 + $0x1b0] ss:$8 sps:$4 sm:$0xff]  }
  0x21   : > { %926 = vmatprep.subr.bf16.mxu0 %v2573_v1  ;;  %2387 = vmatprep.subr.bf16.mxu1 %v2573_v1  ;;  %v2527_v2 = vld [vmem:[%s2641_s30 + $0x1c4] ss:$8 sps:$4 sm:$0xff]   ;;  %v2529_v3 = vld [vmem:[%s2641_s30 + $0xc0] ss:$8 sps:$4 sm:$0xff]   ;;  %v2531_v5 = vld [vmem:[%s2641_s30 + $0xd4] ss:$8 sps:$4 sm:$0xff]  }
  0x22   : > { %v2530_v4 = vld [vmem:[%s2641_s30 + $0x1c0] ss:$8 sps:$4 sm:$0xff]   ;;  %v2533_v6 = vld [vmem:[%s2641_s30 + $0x1d4] ss:$8 sps:$4 sm:$0xff]   ;;  %v2535_v7 = vld [vmem:[%s2641_s30 + $0xd0] ss:$8 sps:$4 sm:$0xff]  }
  0x23   : > { %v2536_v8 = vld [vmem:[%s2641_s30 + $0x1d0] ss:$8 sps:$4 sm:$0xff]   ;;  %v2537_v9 = vld [vmem:[%s2641_s30 + $0xe4] ss:$8 sps:$4 sm:$0xff]  }
  0x24   : > { %927 = vmatpush1.bf16.msra.mxu0 %v2444_v10  ;;  %2403 = vmatpush1.bf16.msra.mxu1 %v2444_v10  ;;  %v2539_v10 = vld [vmem:[%s2641_s30 + $0x1e4] ss:$8 sps:$4 sm:$0xff]  }
  0x25   : > { %928 = vmatprep.subr.bf16.mxu0 %v2573_v1  ;;  %2388 = vmatprep.subr.bf16.mxu1 %v2573_v1 }
  0x28   : > { %929 = vmatpush1.bf16.msra.mxu0 %v2445_v11  ;;  %2404 = vmatpush1.bf16.msra.mxu1 %v2445_v11  ;;  %v2541_v11 = vld [vmem:[%s2641_s30 + $0xe0] ss:$8 sps:$4 sm:$0xff]  }
  0x29   : > { %930 = vmatprep.subr.bf16.mxu0 %v2573_v1  ;;  %2389 = vmatprep.subr.bf16.mxu1 %v2573_v1 }
  0x2c   : > { %931 = vmatpush1.bf16.msra.mxu0 %v2446_v12  ;;  %2405 = vmatpush1.bf16.msra.mxu1 %v2446_v12  ;;  %v2542_v12 = vld [vmem:[%s2641_s30 + $0x1e0] ss:$8 sps:$4 sm:$0xff]  }
  0x2d   : > { %932 = vmatprep.subr.bf16.mxu0 %v2573_v1  ;;  %2390 = vmatprep.subr.bf16.mxu1 %v2573_v1 }
  0x30   : > { %933 = vmatpush1.bf16.msra.mxu0 %v2447_v13  ;;  %2406 = vmatpush1.bf16.msra.mxu1 %v2447_v13  ;;  %v2543_v13 = vld [vmem:[%s2641_s30 + $0xf4] ss:$8 sps:$4 sm:$0xff]  }
  0x31   : > { %934 = vmatprep.subr.bf16.mxu0 %v2573_v1  ;;  %2391 = vmatprep.subr.bf16.mxu1 %v2573_v1 }
  0x34   : > { %935 = vmatpush1.bf16.msra.mxu0 %v2448_v14  ;;  %2407 = vmatpush1.bf16.msra.mxu1 %v2448_v14  ;;  %v2545_v14 = vld [vmem:[%s2641_s30 + $0x1f4] ss:$8 sps:$4 sm:$0xff]  }
  0x35   : > { %936 = vmatprep.subr.bf16.mxu0 %v2573_v1  ;;  %2392 = vmatprep.subr.bf16.mxu1 %v2573_v1 }
  0x38   : > { %937 = vmatpush1.bf16.msra.mxu0 %v2449_v15  ;;  %2408 = vmatpush1.bf16.msra.mxu1 %v2449_v15  ;;  %v2547_v15 = vld [vmem:[%s2641_s30 + $0xf0] ss:$8 sps:$4 sm:$0xff]  }
  0x39   : > { %938 = vmatprep.subr.bf16.mxu0 %v2573_v1  ;;  %2393 = vmatprep.subr.bf16.mxu1 %v2573_v1 }
  0x3c   : > { %939 = vmatpush1.bf16.msra.mxu0 %v2450_v16  ;;  %2409 = vmatpush1.bf16.msra.mxu1 %v2450_v16  ;;  %v2548_v16 = vld [vmem:[%s2641_s30 + $0x1f0] ss:$8 sps:$4 sm:$0xff]  }
  0x3d   : > { %940 = vmatprep.subr.bf16.mxu0 %v2573_v1  ;;  %2394 = vmatprep.subr.bf16.mxu1 %v2573_v1 }
  0x40   : > { %941 = vmatpush1.bf16.msra.mxu0 %v2451_v17  ;;  %2410 = vmatpush1.bf16.msra.mxu1 %v2451_v17  ;;  %v2767_v17 = vld [vmem:[%s2882_s2] ss:$0 sm:$0xff] }
  0x41   : > { %942 = vmatprep.subr.bf16.mxu0 %v2573_v1  ;;  %2395 = vmatprep.subr.bf16.mxu1 %v2573_v1  ;;  %v2525_v1 = vld [vmem:[%s2641_s30 + $0xc4] ss:$8 sps:$4 sm:$0xff]  }
  0x44   : > { %943 = vmatpush1.bf16.msra.mxu0 %v2452_v18  ;;  %2411 = vmatpush1.bf16.msra.mxu1 %v2452_v18 }
  0x47   : > { %945 = vmatmul.mubr.bf16.vlgmr.msra.gmra.mrb[0].mxu0 %v2453_v19  ;;  %1073 = vmatmul.mubr.bf16.vlgmr.msra.gmra.mrb[0].mxu1 %v2456_v20 }
  0x48   : > { %952 = vmatprep.mubr.bf16.mxu0 %v2459_v21  ;;  %1080 = vmatprep.mubr.bf16.mxu1 %v2461_v22 }
  0x4f   : > { %953 = vmatmul.mubr.bf16.gmra.mrb[4].mxu0 %v2463_v23  ;;  %1081 = vmatmul.mubr.bf16.gmra.mrb[4].mxu1 %v2464_v24 }
  0x50   : > { %960 = vmatprep.mubr.bf16.mxu0 %v2465_v25  ;;  %1088 = vmatprep.mubr.bf16.mxu1 %v2467_v26 }
  0x57   : > { %961 = vmatmul.mubr.bf16.gmra.mrb[8].mxu0 %v2469_v27  ;;  %1089 = vmatmul.mubr.bf16.gmra.mrb[8].mxu1 %v2470_v28 }
  0x58   : > { %968 = vmatprep.mubr.bf16.mxu0 %v2471_v29  ;;  %1096 = vmatprep.mubr.bf16.mxu1 %v2473_v30 }
  0x5f   : > { %969 = vmatmul.mubr.bf16.gmra.mrb[12].mxu0 %v2475_v31  ;;  %1097 = vmatmul.mubr.bf16.gmra.mrb[12].mxu1 %v2476_v32 }
  0x60   : > { %976 = vmatprep.mubr.bf16.mxu0 %v2477_v33  ;;  %1104 = vmatprep.mubr.bf16.mxu1 %v2479_v34 }
  0x67   : > { %977 = vmatmul.mubr.bf16.gmra.mrb[16].mxu0 %v2481_v35  ;;  %1105 = vmatmul.mubr.bf16.gmra.mrb[16].mxu1 %v2482_v36 }
  0x68   : > { %984 = vmatprep.mubr.bf16.mxu0 %v2483_v37  ;;  %1112 = vmatprep.mubr.bf16.mxu1 %v2485_v38 }
  0x6f   : > { %985 = vmatmul.mubr.bf16.gmra.mrb[20].mxu0 %v2487_v39  ;;  %1113 = vmatmul.mubr.bf16.gmra.mrb[20].mxu1 %v2488_v40 }
  0x70   : > { %992 = vmatprep.mubr.bf16.mxu0 %v2489_v41  ;;  %1120 = vmatprep.mubr.bf16.mxu1 %v2491_v42 }
  0x77   : > { %993 = vmatmul.mubr.bf16.gmra.mrb[24].mxu0 %v2493_v43  ;;  %1121 = vmatmul.mubr.bf16.gmra.mrb[24].mxu1 %v2494_v44 }
  0x78   : > { %1000 = vmatprep.mubr.bf16.mxu0 %v2495_v45  ;;  %1128 = vmatprep.mubr.bf16.mxu1 %v2497_v46 }
  0x7f   : > { %1001 = vmatmul.mubr.bf16.gmra.mrb[28].mxu0 %v2499_v47  ;;  %1129 = vmatmul.mubr.bf16.gmra.mrb[28].mxu1 %v2500_v48 }
  0x80   : > { %1008 = vmatprep.mubr.bf16.mxu0 %v2501_v49  ;;  %1136 = vmatprep.mubr.bf16.mxu1 %v2503_v50 }
  0x87   : > { %1009 = vmatmul.mubr.bf16.gmra.mrb[32].mxu0 %v2505_v51  ;;  %1137 = vmatmul.mubr.bf16.gmra.mrb[32].mxu1 %v2506_v52 }
  0x88   : > { %1016 = vmatprep.mubr.bf16.mxu0 %v2507_v53  ;;  %1144 = vmatprep.mubr.bf16.mxu1 %v2509_v54 }
  0x8f   : > { %1017 = vmatmul.mubr.bf16.gmra.mrb[36].mxu0 %v2511_v55  ;;  %1145 = vmatmul.mubr.bf16.gmra.mrb[36].mxu1 %v2512_v56 }
  0x90   : > { %1024 = vmatprep.mubr.bf16.mxu0 %v2513_v57  ;;  %1152 = vmatprep.mubr.bf16.mxu1 %v2515_v58 }
  0x97   : > { %1025 = vmatmul.mubr.bf16.gmra.mrb[40].mxu0 %v2517_v59  ;;  %1153 = vmatmul.mubr.bf16.gmra.mrb[40].mxu1 %v2518_v60 }
  0x98   : > { %1032 = vmatprep.mubr.bf16.mxu0 %v2519_v61  ;;  %1160 = vmatprep.mubr.bf16.mxu1 %v2521_v62 }
  0x9f   : > { %1033 = vmatmul.mubr.bf16.gmra.mrb[44].mxu0 %v2523_v63  ;;  %1161 = vmatmul.mubr.bf16.gmra.mrb[44].mxu1 %v2524_v0 }
  0xa0   : > { %1040 = vmatprep.mubr.bf16.mxu0 %v2525_v1  ;;  %1168 = vmatprep.mubr.bf16.mxu1 %v2527_v2 }
  0xa7   : > { %1041 = vmatmul.mubr.bf16.gmra.mrb[48].mxu0 %v2529_v3  ;;  %1169 = vmatmul.mubr.bf16.gmra.mrb[48].mxu1 %v2530_v4 }
  0xa8   : > { %1048 = vmatprep.mubr.bf16.mxu0 %v2531_v5  ;;  %1176 = vmatprep.mubr.bf16.mxu1 %v2533_v6 }
  0xaf   : > { %1049 = vmatmul.mubr.bf16.gmra.mrb[52].mxu0 %v2535_v7  ;;  %1177 = vmatmul.mubr.bf16.gmra.mrb[52].mxu1 %v2536_v8 }
  0xb0   : > { %1056 = vmatprep.mubr.bf16.mxu0 %v2537_v9  ;;  %1184 = vmatprep.mubr.bf16.mxu1 %v2539_v10 }
  0xb7   : > { %1057 = vmatmul.mubr.bf16.gmra.mrb[56].mxu0 %v2541_v11  ;;  %1185 = vmatmul.mubr.bf16.gmra.mrb[56].mxu1 %v2542_v12 }
  0xb8   : > { %1064 = vmatprep.mubr.bf16.mxu0 %v2543_v13  ;;  %1192 = vmatprep.mubr.bf16.mxu1 %v2545_v14 }
  0xbf   : > { %1065 = vmatmul.mubr.bf16.gmra.mrb[60].mxu0 %v2547_v15  ;;  %1193 = vmatmul.mubr.bf16.gmra.mrb[60].mxu1 %v2548_v16 }
 0x11a   : > { %v946_v18 = vpop.f32.mrb[0].mxu0  ;;  %v1074_v19 = vpop.f32.mrb[0].mxu1 }
 0x11b   : > { %v1403_v20 = vadd.f32 %v2767_v17, %v946_v18  ;;  %v1435_v21 = vadd.f32 %v2767_v17, %v1074_v19  ;;  %v948_v22 = vpop.f32.mrb[1].mxu0  ;;  %v1076_v23 = vpop.f32.mrb[1].mxu1 }
 0x11c   : > { %v949_v24 = vpop.f32.mrb[2].mxu0  ;;  %v1077_v25 = vpop.f32.mrb[2].mxu1 }
 0x11d   : > { %v1404_v26 = vadd.f32 %v2767_v17, %v949_v24  ;;  %v1436_v27 = vadd.f32 %v2767_v17, %v1077_v25  ;;  %v951_v28 = vpop.f32.mrb[3].mxu0  ;;  %v1079_v29 = vpop.f32.mrb[3].mxu1  ;;  %v1467_v30 = vmax.f32 %v1403_v20, 0.0  ;;  %v1499_v31 = vmax.f32 %v1435_v21, 0.0 }
 0x11f   : > { %v1468_v32 = vmax.f32 %v1404_v26, 0.0  ;;  %v1500_v33 = vmax.f32 %v1436_v27, 0.0 }
 0x121   : > { %v2192_v34 = vpack.c.bf16 %v1468_v32, %v1467_v30  ;;  %v2272_v35 = vpack.c.bf16 %v1500_v33, %v1499_v31 }
 0x122   : > { %v954_v36 = vpop.f32.mrb[4].mxu0  ;;  %v1082_v37 = vpop.f32.mrb[4].mxu1 }
 0x123   : > { %2193 = vst [vmem:[%s2777_s8] sm:$0xff] %v2192_v34   ;;  %2364 = vst [vmem:[%s2777_s8 + $0x80] sm:$0xff] %v2272_v35   ;;  %v1405_v38 = vadd.f32 %v2767_v17, %v954_v36  ;;  %v1437_v39 = vadd.f32 %v2767_v17, %v1082_v37  ;;  %v956_v40 = vpop.f32.mrb[5].mxu0  ;;  %v1084_v41 = vpop.f32.mrb[5].mxu1 }
 0x124   : > { %v957_v42 = vpop.f32.mrb[6].mxu0  ;;  %v1085_v43 = vpop.f32.mrb[6].mxu1 }
 0x125   : > { %v1406_v44 = vadd.f32 %v2767_v17, %v957_v42  ;;  %v1438_v45 = vadd.f32 %v2767_v17, %v1085_v43  ;;  %v959_v46 = vpop.f32.mrb[7].mxu0  ;;  %v1087_v47 = vpop.f32.mrb[7].mxu1  ;;  %v1469_v48 = vmax.f32 %v1405_v38, 0.0  ;;  %v1501_v49 = vmax.f32 %v1437_v39, 0.0 }
 0x127   : > { %v1470_v50 = vmax.f32 %v1406_v44, 0.0  ;;  %v1502_v51 = vmax.f32 %v1438_v45, 0.0 }
 0x129   : > { %v2197_v52 = vpack.c.bf16 %v1470_v50, %v1469_v48  ;;  %v2277_v53 = vpack.c.bf16 %v1502_v51, %v1501_v49 }
 0x12a   : > { %v962_v54 = vpop.f32.mrb[8].mxu0  ;;  %v1090_v55 = vpop.f32.mrb[8].mxu1 }
 0x12b   : > { %2349 = vst [vmem:[%s2777_s8 + $0x8] sm:$0xff] %v2197_v52   ;;  %2365 = vst [vmem:[%s2777_s8 + $0x88] sm:$0xff] %v2277_v53   ;;  %v1407_v56 = vadd.f32 %v2767_v17, %v962_v54  ;;  %v1439_v57 = vadd.f32 %v2767_v17, %v1090_v55  ;;  %v964_v58 = vpop.f32.mrb[9].mxu0  ;;  %v1092_v59 = vpop.f32.mrb[9].mxu1 }
 0x12c   : > { %v965_v60 = vpop.f32.mrb[10].mxu0  ;;  %v1093_v61 = vpop.f32.mrb[10].mxu1 }
 0x12d   : > { %v1408_v62 = vadd.f32 %v2767_v17, %v965_v60  ;;  %v1440_v63 = vadd.f32 %v2767_v17, %v1093_v61  ;;  %v967_v0 = vpop.f32.mrb[11].mxu0  ;;  %v1095_v1 = vpop.f32.mrb[11].mxu1  ;;  %v1471_v2 = vmax.f32 %v1407_v56, 0.0  ;;  %v1503_v3 = vmax.f32 %v1439_v57, 0.0 }
 0x12f   : > { %v1472_v4 = vmax.f32 %v1408_v62, 0.0  ;;  %v1504_v5 = vmax.f32 %v1440_v63, 0.0 }
 0x131   : > { %v2202_v6 = vpack.c.bf16 %v1472_v4, %v1471_v2  ;;  %v2282_v7 = vpack.c.bf16 %v1504_v5, %v1503_v3 }
 0x132   : > { %v970_v8 = vpop.f32.mrb[12].mxu0  ;;  %v1098_v9 = vpop.f32.mrb[12].mxu1 }
 0x133   : > { %2350 = vst [vmem:[%s2777_s8 + $0x10] sm:$0xff] %v2202_v6   ;;  %2366 = vst [vmem:[%s2777_s8 + $0x90] sm:$0xff] %v2282_v7   ;;  %v1409_v10 = vadd.f32 %v2767_v17, %v970_v8  ;;  %v1441_v11 = vadd.f32 %v2767_v17, %v1098_v9  ;;  %v972_v12 = vpop.f32.mrb[13].mxu0  ;;  %v1100_v13 = vpop.f32.mrb[13].mxu1 }
 0x134   : > { %v973_v14 = vpop.f32.mrb[14].mxu0  ;;  %v1101_v15 = vpop.f32.mrb[14].mxu1 }
 0x135   : > { %v1410_v16 = vadd.f32 %v2767_v17, %v973_v14  ;;  %v1442_v18 = vadd.f32 %v2767_v17, %v1101_v15  ;;  %v975_v19 = vpop.f32.mrb[15].mxu0  ;;  %v1103_v20 = vpop.f32.mrb[15].mxu1  ;;  %v1473_v21 = vmax.f32 %v1409_v10, 0.0  ;;  %v1505_v22 = vmax.f32 %v1441_v11, 0.0 }
 0x137   : > { %v1474_v23 = vmax.f32 %v1410_v16, 0.0  ;;  %v1506_v24 = vmax.f32 %v1442_v18, 0.0 }
 0x139   : > { %v2207_v25 = vpack.c.bf16 %v1474_v23, %v1473_v21  ;;  %v2287_v26 = vpack.c.bf16 %v1506_v24, %v1505_v22 }
 0x13a   : > { %v978_v27 = vpop.f32.mrb[16].mxu0  ;;  %v1106_v28 = vpop.f32.mrb[16].mxu1 }
 0x13b   : > { %2351 = vst [vmem:[%s2777_s8 + $0x18] sm:$0xff] %v2207_v25   ;;  %2367 = vst [vmem:[%s2777_s8 + $0x98] sm:$0xff] %v2287_v26   ;;  %v1411_v29 = vadd.f32 %v2767_v17, %v978_v27  ;;  %v1443_v30 = vadd.f32 %v2767_v17, %v1106_v28  ;;  %v980_v31 = vpop.f32.mrb[17].mxu0  ;;  %v1108_v32 = vpop.f32.mrb[17].mxu1 }
 0x13c   : > { %v981_v33 = vpop.f32.mrb[18].mxu0  ;;  %v1109_v34 = vpop.f32.mrb[18].mxu1 }
 0x13d   : > { %v1412_v35 = vadd.f32 %v2767_v17, %v981_v33  ;;  %v1444_v36 = vadd.f32 %v2767_v17, %v1109_v34  ;;  %v983_v37 = vpop.f32.mrb[19].mxu0  ;;  %v1111_v38 = vpop.f32.mrb[19].mxu1  ;;  %v1475_v39 = vmax.f32 %v1411_v29, 0.0  ;;  %v1507_v40 = vmax.f32 %v1443_v30, 0.0 }
 0x13f   : > { %v1476_v41 = vmax.f32 %v1412_v35, 0.0  ;;  %v1508_v42 = vmax.f32 %v1444_v36, 0.0 }
 0x141   : > { %v2212_v43 = vpack.c.bf16 %v1476_v41, %v1475_v39  ;;  %v2292_v44 = vpack.c.bf16 %v1508_v42, %v1507_v40 }
 0x142   : > { %v986_v45 = vpop.f32.mrb[20].mxu0  ;;  %v1114_v46 = vpop.f32.mrb[20].mxu1 }
 0x143   : > { %2352 = vst [vmem:[%s2777_s8 + $0x20] sm:$0xff] %v2212_v43   ;;  %2368 = vst [vmem:[%s2777_s8 + $0xa0] sm:$0xff] %v2292_v44   ;;  %v1413_v47 = vadd.f32 %v2767_v17, %v986_v45  ;;  %v1445_v48 = vadd.f32 %v2767_v17, %v1114_v46  ;;  %v988_v49 = vpop.f32.mrb[21].mxu0  ;;  %v1116_v50 = vpop.f32.mrb[21].mxu1 }
 0x144   : > { %v989_v51 = vpop.f32.mrb[22].mxu0  ;;  %v1117_v52 = vpop.f32.mrb[22].mxu1 }
 0x145   : > { %v1414_v53 = vadd.f32 %v2767_v17, %v989_v51  ;;  %v1446_v54 = vadd.f32 %v2767_v17, %v1117_v52  ;;  %v991_v55 = vpop.f32.mrb[23].mxu0  ;;  %v1119_v56 = vpop.f32.mrb[23].mxu1  ;;  %v1477_v57 = vmax.f32 %v1413_v47, 0.0  ;;  %v1509_v58 = vmax.f32 %v1445_v48, 0.0 }
 0x147   : > { %v1478_v59 = vmax.f32 %v1414_v53, 0.0  ;;  %v1510_v60 = vmax.f32 %v1446_v54, 0.0 }
 0x149   : > { %v2217_v61 = vpack.c.bf16 %v1478_v59, %v1477_v57  ;;  %v2297_v62 = vpack.c.bf16 %v1510_v60, %v1509_v58 }
 0x14a   : > { %v994_v63 = vpop.f32.mrb[24].mxu0  ;;  %v1122_v0 = vpop.f32.mrb[24].mxu1 }
 0x14b   : > { %2353 = vst [vmem:[%s2777_s8 + $0x28] sm:$0xff] %v2217_v61   ;;  %2369 = vst [vmem:[%s2777_s8 + $0xa8] sm:$0xff] %v2297_v62   ;;  %v1415_v1 = vadd.f32 %v2767_v17, %v994_v63  ;;  %v1447_v2 = vadd.f32 %v2767_v17, %v1122_v0  ;;  %v996_v3 = vpop.f32.mrb[25].mxu0  ;;  %v1124_v4 = vpop.f32.mrb[25].mxu1 }
 0x14c   : > { %v997_v5 = vpop.f32.mrb[26].mxu0  ;;  %v1125_v6 = vpop.f32.mrb[26].mxu1 }
 0x14d   : > { %v1416_v7 = vadd.f32 %v2767_v17, %v997_v5  ;;  %v1448_v8 = vadd.f32 %v2767_v17, %v1125_v6  ;;  %v999_v9 = vpop.f32.mrb[27].mxu0  ;;  %v1127_v10 = vpop.f32.mrb[27].mxu1  ;;  %v1479_v11 = vmax.f32 %v1415_v1, 0.0  ;;  %v1511_v12 = vmax.f32 %v1447_v2, 0.0 }
 0x14f   : > { %v1480_v13 = vmax.f32 %v1416_v7, 0.0  ;;  %v1512_v14 = vmax.f32 %v1448_v8, 0.0 }
 0x151   : > { %v2222_v15 = vpack.c.bf16 %v1480_v13, %v1479_v11  ;;  %v2302_v16 = vpack.c.bf16 %v1512_v14, %v1511_v12 }
 0x152   : > { %v1002_v18 = vpop.f32.mrb[28].mxu0  ;;  %v1130_v19 = vpop.f32.mrb[28].mxu1 }
 0x153   : > { %2354 = vst [vmem:[%s2777_s8 + $0x30] sm:$0xff] %v2222_v15   ;;  %2370 = vst [vmem:[%s2777_s8 + $0xb0] sm:$0xff] %v2302_v16   ;;  %v1417_v20 = vadd.f32 %v2767_v17, %v1002_v18  ;;  %v1449_v21 = vadd.f32 %v2767_v17, %v1130_v19  ;;  %v1004_v22 = vpop.f32.mrb[29].mxu0  ;;  %v1132_v23 = vpop.f32.mrb[29].mxu1 }
 0x154   : > { %v1005_v24 = vpop.f32.mrb[30].mxu0  ;;  %v1133_v25 = vpop.f32.mrb[30].mxu1 }
 0x155   : > { %v1418_v26 = vadd.f32 %v2767_v17, %v1005_v24  ;;  %v1450_v27 = vadd.f32 %v2767_v17, %v1133_v25  ;;  %v1007_v28 = vpop.f32.mrb[31].mxu0  ;;  %v1135_v29 = vpop.f32.mrb[31].mxu1  ;;  %v1481_v30 = vmax.f32 %v1417_v20, 0.0  ;;  %v1513_v31 = vmax.f32 %v1449_v21, 0.0 }
 0x157   : > { %v1482_v32 = vmax.f32 %v1418_v26, 0.0  ;;  %v1514_v33 = vmax.f32 %v1450_v27, 0.0 }
 0x159   : > { %v2227_v34 = vpack.c.bf16 %v1482_v32, %v1481_v30  ;;  %v2307_v35 = vpack.c.bf16 %v1514_v33, %v1513_v31 }
 0x15a   : > { %v1010_v36 = vpop.f32.mrb[32].mxu0  ;;  %v1138_v37 = vpop.f32.mrb[32].mxu1 }
 0x15b   : > { %2355 = vst [vmem:[%s2777_s8 + $0x38] sm:$0xff] %v2227_v34   ;;  %2371 = vst [vmem:[%s2777_s8 + $0xb8] sm:$0xff] %v2307_v35   ;;  %v1419_v38 = vadd.f32 %v2767_v17, %v1010_v36  ;;  %v1451_v39 = vadd.f32 %v2767_v17, %v1138_v37  ;;  %v1012_v40 = vpop.f32.mrb[33].mxu0  ;;  %v1140_v41 = vpop.f32.mrb[33].mxu1 }
 0x15c   : > { %v1013_v42 = vpop.f32.mrb[34].mxu0  ;;  %v1141_v43 = vpop.f32.mrb[34].mxu1 }
 0x15d   : > { %v1420_v44 = vadd.f32 %v2767_v17, %v1013_v42  ;;  %v1452_v45 = vadd.f32 %v2767_v17, %v1141_v43  ;;  %v1015_v46 = vpop.f32.mrb[35].mxu0  ;;  %v1143_v47 = vpop.f32.mrb[35].mxu1  ;;  %v1483_v48 = vmax.f32 %v1419_v38, 0.0  ;;  %v1515_v49 = vmax.f32 %v1451_v39, 0.0 }
 0x15f   : > { %v1484_v50 = vmax.f32 %v1420_v44, 0.0  ;;  %v1516_v51 = vmax.f32 %v1452_v45, 0.0 }
 0x161   : > { %v2232_v52 = vpack.c.bf16 %v1484_v50, %v1483_v48  ;;  %v2312_v53 = vpack.c.bf16 %v1516_v51, %v1515_v49 }
 0x162   : > { %v1018_v54 = vpop.f32.mrb[36].mxu0  ;;  %v1146_v55 = vpop.f32.mrb[36].mxu1 }
 0x163   : > { %2356 = vst [vmem:[%s2777_s8 + $0x40] sm:$0xff] %v2232_v52   ;;  %2372 = vst [vmem:[%s2777_s8 + $0xc0] sm:$0xff] %v2312_v53   ;;  %v1421_v56 = vadd.f32 %v2767_v17, %v1018_v54  ;;  %v1453_v57 = vadd.f32 %v2767_v17, %v1146_v55  ;;  %v1020_v58 = vpop.f32.mrb[37].mxu0  ;;  %v1148_v59 = vpop.f32.mrb[37].mxu1 }
 0x164   : > { %v1021_v60 = vpop.f32.mrb[38].mxu0  ;;  %v1149_v61 = vpop.f32.mrb[38].mxu1 }
 0x165   : > { %v1422_v62 = vadd.f32 %v2767_v17, %v1021_v60  ;;  %v1454_v63 = vadd.f32 %v2767_v17, %v1149_v61  ;;  %v1023_v0 = vpop.f32.mrb[39].mxu0  ;;  %v1151_v1 = vpop.f32.mrb[39].mxu1  ;;  %v1485_v2 = vmax.f32 %v1421_v56, 0.0  ;;  %v1517_v3 = vmax.f32 %v1453_v57, 0.0 }
 0x167   : > { %v1486_v4 = vmax.f32 %v1422_v62, 0.0  ;;  %v1518_v5 = vmax.f32 %v1454_v63, 0.0 }
 0x169   : > { %v2237_v6 = vpack.c.bf16 %v1486_v4, %v1485_v2  ;;  %v2317_v7 = vpack.c.bf16 %v1518_v5, %v1517_v3 }
 0x16a   : > { %v1026_v8 = vpop.f32.mrb[40].mxu0  ;;  %v1154_v9 = vpop.f32.mrb[40].mxu1 }
 0x16b   : > { %2357 = vst [vmem:[%s2777_s8 + $0x48] sm:$0xff] %v2237_v6   ;;  %2373 = vst [vmem:[%s2777_s8 + $0xc8] sm:$0xff] %v2317_v7   ;;  %v1423_v10 = vadd.f32 %v2767_v17, %v1026_v8  ;;  %v1455_v11 = vadd.f32 %v2767_v17, %v1154_v9  ;;  %v1028_v12 = vpop.f32.mrb[41].mxu0  ;;  %v1156_v13 = vpop.f32.mrb[41].mxu1 }
 0x16c   : > { %v1029_v14 = vpop.f32.mrb[42].mxu0  ;;  %v1157_v15 = vpop.f32.mrb[42].mxu1 }
 0x16d   : > { %v1424_v16 = vadd.f32 %v2767_v17, %v1029_v14  ;;  %v1456_v18 = vadd.f32 %v2767_v17, %v1157_v15  ;;  %v1031_v19 = vpop.f32.mrb[43].mxu0  ;;  %v1159_v20 = vpop.f32.mrb[43].mxu1  ;;  %v1487_v21 = vmax.f32 %v1423_v10, 0.0  ;;  %v1519_v22 = vmax.f32 %v1455_v11, 0.0 }
 0x16f   : > { %v1488_v23 = vmax.f32 %v1424_v16, 0.0  ;;  %v1520_v24 = vmax.f32 %v1456_v18, 0.0 }
 0x171   : > { %v2242_v25 = vpack.c.bf16 %v1488_v23, %v1487_v21  ;;  %v2322_v26 = vpack.c.bf16 %v1520_v24, %v1519_v22 }
 0x172   : > { %v1034_v27 = vpop.f32.mrb[44].mxu0  ;;  %v1162_v28 = vpop.f32.mrb[44].mxu1 }
 0x173   : > { %2358 = vst [vmem:[%s2777_s8 + $0x50] sm:$0xff] %v2242_v25   ;;  %2374 = vst [vmem:[%s2777_s8 + $0xd0] sm:$0xff] %v2322_v26   ;;  %v1425_v29 = vadd.f32 %v2767_v17, %v1034_v27  ;;  %v1457_v30 = vadd.f32 %v2767_v17, %v1162_v28  ;;  %v1036_v31 = vpop.f32.mrb[45].mxu0  ;;  %v1164_v32 = vpop.f32.mrb[45].mxu1 }
 0x174   : > { %v1037_v33 = vpop.f32.mrb[46].mxu0  ;;  %v1165_v34 = vpop.f32.mrb[46].mxu1 }
 0x175   : > { %v1426_v35 = vadd.f32 %v2767_v17, %v1037_v33  ;;  %v1458_v36 = vadd.f32 %v2767_v17, %v1165_v34  ;;  %v1039_v37 = vpop.f32.mrb[47].mxu0  ;;  %v1167_v38 = vpop.f32.mrb[47].mxu1  ;;  %v1489_v39 = vmax.f32 %v1425_v29, 0.0  ;;  %v1521_v40 = vmax.f32 %v1457_v30, 0.0 }
 0x177   : > { %v1490_v41 = vmax.f32 %v1426_v35, 0.0  ;;  %v1522_v42 = vmax.f32 %v1458_v36, 0.0 }
 0x179   : > { %v2247_v43 = vpack.c.bf16 %v1490_v41, %v1489_v39  ;;  %v2327_v44 = vpack.c.bf16 %v1522_v42, %v1521_v40 }
 0x17a   : > { %v1042_v45 = vpop.f32.mrb[48].mxu0  ;;  %v1170_v46 = vpop.f32.mrb[48].mxu1 }
 0x17b   : > { %2359 = vst [vmem:[%s2777_s8 + $0x58] sm:$0xff] %v2247_v43   ;;  %2375 = vst [vmem:[%s2777_s8 + $0xd8] sm:$0xff] %v2327_v44   ;;  %v1427_v47 = vadd.f32 %v2767_v17, %v1042_v45  ;;  %v1459_v48 = vadd.f32 %v2767_v17, %v1170_v46  ;;  %v1044_v49 = vpop.f32.mrb[49].mxu0  ;;  %v1172_v50 = vpop.f32.mrb[49].mxu1 }
 0x17c   : > { %v1045_v51 = vpop.f32.mrb[50].mxu0  ;;  %v1173_v52 = vpop.f32.mrb[50].mxu1 }
 0x17d   : > { %v1428_v53 = vadd.f32 %v2767_v17, %v1045_v51  ;;  %v1460_v54 = vadd.f32 %v2767_v17, %v1173_v52  ;;  %v1047_v55 = vpop.f32.mrb[51].mxu0  ;;  %v1175_v56 = vpop.f32.mrb[51].mxu1  ;;  %v1491_v57 = vmax.f32 %v1427_v47, 0.0  ;;  %v1523_v58 = vmax.f32 %v1459_v48, 0.0 }
 0x17f   : > { %v1492_v59 = vmax.f32 %v1428_v53, 0.0  ;;  %v1524_v60 = vmax.f32 %v1460_v54, 0.0 }
 0x181   : > { %v2252_v61 = vpack.c.bf16 %v1492_v59, %v1491_v57  ;;  %v2332_v62 = vpack.c.bf16 %v1524_v60, %v1523_v58 }
 0x182   : > { %v1050_v63 = vpop.f32.mrb[52].mxu0  ;;  %v1178_v0 = vpop.f32.mrb[52].mxu1 }
 0x183   : > { %2360 = vst [vmem:[%s2777_s8 + $0x60] sm:$0xff] %v2252_v61   ;;  %2376 = vst [vmem:[%s2777_s8 + $0xe0] sm:$0xff] %v2332_v62   ;;  %v1429_v1 = vadd.f32 %v2767_v17, %v1050_v63  ;;  %v1461_v2 = vadd.f32 %v2767_v17, %v1178_v0  ;;  %v1052_v3 = vpop.f32.mrb[53].mxu0  ;;  %v1180_v4 = vpop.f32.mrb[53].mxu1 }
 0x184   : > { %v1053_v5 = vpop.f32.mrb[54].mxu0  ;;  %v1181_v6 = vpop.f32.mrb[54].mxu1 }
 0x185   : > { %v1430_v7 = vadd.f32 %v2767_v17, %v1053_v5  ;;  %v1462_v8 = vadd.f32 %v2767_v17, %v1181_v6  ;;  %v1055_v9 = vpop.f32.mrb[55].mxu0  ;;  %v1183_v10 = vpop.f32.mrb[55].mxu1  ;;  %v1493_v11 = vmax.f32 %v1429_v1, 0.0  ;;  %v1525_v12 = vmax.f32 %v1461_v2, 0.0 }
 0x187   : > { %v1494_v13 = vmax.f32 %v1430_v7, 0.0  ;;  %v1526_v14 = vmax.f32 %v1462_v8, 0.0 }
 0x189   : > { %v2257_v15 = vpack.c.bf16 %v1494_v13, %v1493_v11  ;;  %v2337_v16 = vpack.c.bf16 %v1526_v14, %v1525_v12 }
 0x18a   : > { %v1058_v18 = vpop.f32.mrb[56].mxu0  ;;  %v1186_v19 = vpop.f32.mrb[56].mxu1 }
 0x18b   : > { %2361 = vst [vmem:[%s2777_s8 + $0x68] sm:$0xff] %v2257_v15   ;;  %2377 = vst [vmem:[%s2777_s8 + $0xe8] sm:$0xff] %v2337_v16   ;;  %v1431_v20 = vadd.f32 %v2767_v17, %v1058_v18  ;;  %v1463_v21 = vadd.f32 %v2767_v17, %v1186_v19  ;;  %v1060_v22 = vpop.f32.mrb[57].mxu0  ;;  %v1188_v23 = vpop.f32.mrb[57].mxu1 }
 0x18c   : > { %v1061_v24 = vpop.f32.mrb[58].mxu0  ;;  %v1189_v25 = vpop.f32.mrb[58].mxu1 }
 0x18d   : > { %v1432_v26 = vadd.f32 %v2767_v17, %v1061_v24  ;;  %v1464_v27 = vadd.f32 %v2767_v17, %v1189_v25  ;;  %v1063_v28 = vpop.f32.mrb[59].mxu0  ;;  %v1191_v29 = vpop.f32.mrb[59].mxu1  ;;  %v1495_v30 = vmax.f32 %v1431_v20, 0.0  ;;  %v1527_v31 = vmax.f32 %v1463_v21, 0.0 }
 0x18f   : > { %v1496_v32 = vmax.f32 %v1432_v26, 0.0  ;;  %v1528_v33 = vmax.f32 %v1464_v27, 0.0 }
 0x191   : > { %v2262_v34 = vpack.c.bf16 %v1496_v32, %v1495_v30  ;;  %v2342_v35 = vpack.c.bf16 %v1528_v33, %v1527_v31 }
 0x192   : > { %v1066_v36 = vpop.f32.mrb[60].mxu0  ;;  %v1194_v37 = vpop.f32.mrb[60].mxu1 }
 0x193   : > { %2362 = vst [vmem:[%s2777_s8 + $0x70] sm:$0xff] %v2262_v34   ;;  %2378 = vst [vmem:[%s2777_s8 + $0xf0] sm:$0xff] %v2342_v35   ;;  %v1433_v38 = vadd.f32 %v2767_v17, %v1066_v36  ;;  %v1465_v39 = vadd.f32 %v2767_v17, %v1194_v37  ;;  %v1068_v40 = vpop.f32.mrb[61].mxu0  ;;  %v1196_v41 = vpop.f32.mrb[61].mxu1 }
 0x194   : > { %v1069_v42 = vpop.f32.mrb[62].mxu0  ;;  %v1197_v43 = vpop.f32.mrb[62].mxu1 }
 0x195   : > { %v1434_v44 = vadd.f32 %v2767_v17, %v1069_v42  ;;  %v1466_v45 = vadd.f32 %v2767_v17, %v1197_v43  ;;  %v1071_v46 = vpop.f32.mrb[63].mxu0  ;;  %v1199_v47 = vpop.f32.mrb[63].mxu1  ;;  %v1497_v48 = vmax.f32 %v1433_v38, 0.0  ;;  %v1529_v49 = vmax.f32 %v1465_v39, 0.0 }
 0x197   : > { %v1498_v50 = vmax.f32 %v1434_v44, 0.0  ;;  %v1530_v51 = vmax.f32 %v1466_v45, 0.0 }
 0x199   : > { %v2267_v52 = vpack.c.bf16 %v1498_v50, %v1497_v48  ;;  %v2347_v53 = vpack.c.bf16 %v1530_v51, %v1529_v49 }
 0x19b   : > { %2363 = vst [vmem:[%s2777_s8 + $0x78] sm:$0xff] %v2267_v52   ;;  %2379 = vst [vmem:[%s2777_s8 + $0xf8] sm:$0xff] %v2347_v53  }
 0x19c PF: > { %s13_s14 = sadd.s32 1, %s2571_s14   ;;  %s2884_s12 = smov %s2567_s13 }
 0x19d   : > { %p10_p5 = scmp.ge.s32.totalorder %s13_s14, 18   ;;  %s2885_s13 = smov %s2887_s15 }
 0x19f   :  { %12 = sbr.rel (!%p10_p5) target bundleno = 2 (0x2), region = 76 }

</bundles_post_ra>
